<compile_context>
chip_gen: v7x
topology: tpu7x:2x2x1
jax: 0.10.0
libtpu: 0.0.40
codegen_flags: <defaults>
</compile_context>

<pallas_src>
import functools

import jax
import jax.numpy as jnp
from jax.experimental import pallas as pl
from jax.experimental.pallas import tpu as pltpu

_LANE = 128
_SUBLANE = 8


def _round_up(v, m):
    return ((v + m - 1) // m) * m


def _patch_embed_matmul_kernel(x_ref, w_ref, o_ref):
    """Single-shot (full-K) matmul tile: [tm, K] @ [K, tn] -> [tm, tn]."""
    o_ref[...] = jnp.dot(
        x_ref[...], w_ref[...], preferred_element_type=jnp.float32
    ).astype(o_ref.dtype)


def _pick_tiles(M, K, E, in_itemsize, out_itemsize, vmem_budget):
    """Pick (tm, tn) for the full-K matmul.

    tm: up to 512 rows; keep >=2 M-blocks when M allows it (v7x megacore);
        full-extent block when M is small.
    tn: the whole embed dim if the double-buffered footprint fits the budget,
        otherwise the largest 128-multiple divisor of E that fits (so nj * tn
        == E exactly and no garbage ever enters the contraction).
    """
    if M > 1024:
        tm = 512
    elif M > 256:
        tm = _round_up(-(-M // 2), _SUBLANE)  # two (roughly equal) M blocks
    else:
        tm = M  # single full-extent block

    candidates = [E]
    if E % _LANE == 0:
        candidates += [
            t for t in (1024, 768, 640, 512, 384, 256, 128) if t < E and E % t == 0
        ]
    tn = candidates[-1]
    for cand in candidates:
        footprint = 2 * (
            tm * K * in_itemsize + K * cand * in_itemsize + tm * cand * out_itemsize
        )
        if footprint <= vmem_budget:
            tn = cand
            break
    return tm, tn


@functools.partial(
    jax.jit, static_argnames=("patch_size", "compute_dtype", "out_dtype")
)
def patch_embed_forward(
    x, w_conv, *, patch_size, compute_dtype=jnp.bfloat16, out_dtype=None
):
    """PatchEmbed.forward.

    x:      [B, C, H, W]          (NCHW, like PyTorch)
    w_conv: [embed_dim, C, P, P]  (PyTorch Conv2d weight layout)
    returns [B, num_patches, embed_dim]

    compute_dtype: dtype fed to the MXU (default bf16; accumulation is always
    f32 via preferred_element_type). Pass None to compute in x.dtype.
    out_dtype: output dtype (default x.dtype).
    """
    B, C, H, W = x.shape
    P = patch_size
    assert H % P == 0 and W % P == 0
    gh, gw = H // P, W // P
    num_patches = gh * gw
    E = w_conv.shape[0]
    K = C * P * P
    M = B * num_patches

    out_dtype = x.dtype if out_dtype is None else jnp.dtype(out_dtype)
    cdt = jnp.dtype(x.dtype) if compute_dtype is None else jnp.dtype(compute_dtype)

    # --- glue: extract non-overlapping patches, flatten in (c, kh, kw) order
    # to match Conv2d's weight contraction order. No padding anywhere.
    xp = x.reshape(B, C, gh, P, gw, P).transpose(0, 2, 4, 1, 3, 5).reshape(M, K)
    w_mat = w_conv.reshape(E, K).T  # [K, E]

    xp = xp.astype(cdt)
    w_mat = w_mat.astype(cdt)

    vmem_budget = 40 * 1024 * 1024  # double-buffered tile footprint cap (v7x-safe)
    tm, tn = _pick_tiles(M, K, E, cdt.itemsize, out_dtype.itemsize, vmem_budget)

    ni = pl.cdiv(M, tm)  # M remainder handled by partial blocks (OOB writes dropped)
    nj = E // tn         # exact by construction (tn == E or a divisor of E)
    grid = (nj, ni)      # E-blocks outermost -> weight block resident across M

    cost = pl.CostEstimate(
        flops=2 * M * K * E,
        transcendentals=0,
        bytes_accessed=(
            nj * M * K * cdt.itemsize        # x streamed once per E-block
            + K * E * cdt.itemsize           # weight fetched once
            + M * E * out_dtype.itemsize     # output written once
        ),
    )

    out = pl.pallas_call(
        _patch_embed_matmul_kernel,
        out_shape=jax.ShapeDtypeStruct((M, E), out_dtype),
        grid_spec=pltpu.PrefetchScalarGridSpec(
            num_scalar_prefetch=0,
            grid=grid,
            in_specs=[
                pl.BlockSpec((tm, K), lambda j, i: (i, 0)),   # activations: stream M
                pl.BlockSpec((K, tn), lambda j, i: (0, j)),   # weight: resident per j
            ],
            out_specs=pl.BlockSpec((tm, tn), lambda j, i: (i, j)),
        ),
        compiler_params=pltpu.CompilerParams(
            dimension_semantics=("parallel", "parallel"),
            vmem_limit_bytes=48 * 1024 * 1024,
        ),
        cost_estimate=cost,
    )(xp, w_mat)

    # [M, E] -> [B, num_patches, E]  (== Conv2d output .flatten(2).transpose(1, 2))
    return out.reshape(B, num_patches, E)


def reference_patch_embed(x, w_conv, *, patch_size):
    """Pure-JAX reference: strided conv via lax.conv_general_dilated."""
    y = jax.lax.conv_general_dilated(
        x,
        w_conv,
        window_strides=(patch_size, patch_size),
        padding="VALID",
        dimension_numbers=("NCHW", "OIHW", "NCHW"),
    )  # [B, E, gh, gw]
    B, E, gh, gw = y.shape
    return y.reshape(B, E, gh * gw).transpose(0, 2, 1)


if __name__ == "__main__":
    # Small shapes consistent with the module: img_size=16, patch_size=4,
    # in_chans=4, embed_dim=32, batch=2  ->  num_patches = 16, K = 64.
    B, C, H, W = 2, 4, 16, 16
    P = 4
    embed_dim = 32

    key = jax.random.PRNGKey(0)
    kx, kw = jax.random.split(key)
    x = jax.random.normal(kx, (B, C, H, W), dtype=jnp.float32)
    # Deterministic Conv2d-style weight init (synthetic, not a checkpoint load).
    w_conv = jax.random.normal(kw, (embed_dim, C, P, P), dtype=jnp.float32) * 0.02

    ref = reference_patch_embed(x, w_conv, patch_size=P)

    # f32 compute path: bitwise-close to the conv reference.
    out_f32 = patch_embed_forward(x, w_conv, patch_size=P, compute_dtype=jnp.float32)
    out_f32 = jax.block_until_ready(out_f32)
    assert out_f32.shape == (B, (H // P) * (W // P), embed_dim), out_f32.shape
    assert jnp.allclose(out_f32, ref, atol=1e-4, rtol=1e-4), "f32 mismatch vs reference"

    # Default (bf16 compute, f32 accumulation) path: looser tolerance expected.
    out_bf16 = patch_embed_forward(x, w_conv, patch_size=P)
    out_bf16 = jax.block_until_ready(out_bf16)
    assert out_bf16.shape == (B, (H // P) * (W // P), embed_dim), out_bf16.shape
    assert jnp.allclose(out_bf16, ref, atol=1e-2, rtol=5e-2), "bf16 mismatch vs reference"

    print("KERNEL_OK")
</pallas_src>

<mosaic_0001>
module attributes {stable_mosaic.version = 11 : i64} {
  func.func @_patch_embed_matmul_kernel(%arg0: i32, %arg1: i32, %arg2: memref<32x64xf32, #tpu.memory_space<vmem>>, %arg3: memref<64x32xf32, #tpu.memory_space<vmem>>, %arg4: memref<32x32xf32, #tpu.memory_space<vmem>>) attributes {dimension_semantics = [#tpu.dimension_semantics<parallel>, #tpu.dimension_semantics<parallel>], iteration_bounds = array<i64: 1, 1>, scalar_prefetch = 0 : i64, scratch_operands = 0 : i64, tpu.core_type = #tpu.core_type<tc>, window_params = [{transform_indices = @transform_0, window_bounds = array<i64: 32, 64>}, {transform_indices = @transform_1, window_bounds = array<i64: 64, 32>}, {transform_indices = @transform_2, window_bounds = array<i64: 32, 32>}]} {
    %c0 = arith.constant 0 : index
    %c0_0 = arith.constant 0 : index
    %0 = vector.load %arg2[%c0, %c0_0] : memref<32x64xf32, #tpu.memory_space<vmem>>, vector<32x64xf32>
    %c0_1 = arith.constant 0 : index
    %c0_2 = arith.constant 0 : index
    %1 = vector.load %arg3[%c0_1, %c0_2] : memref<64x32xf32, #tpu.memory_space<vmem>>, vector<64x32xf32>
    %cst = arith.constant dense<0.000000e+00> : vector<32x32xf32>
    %2 = tpu.matmul %0, %1, %cst {dimension_numbers = #tpu.dot_dimension_numbers<[1], [0], [0], [1], [0, 0, 1, 1], [], []>} : vector<32x64xf32>, vector<64x32xf32>, vector<32x32xf32> -> vector<32x32xf32>
    %c0_3 = arith.constant 0 : index
    %c0_4 = arith.constant 0 : index
    %3 = vector.load %arg4[%c0_3, %c0_4] : memref<32x32xf32, #tpu.memory_space<vmem>>, vector<32x32xf32>
    tpu.vector_store %arg4[%c0_3, %c0_4], %2 {strides = array<i32>} : memref<32x32xf32, #tpu.memory_space<vmem>>, vector<32x32xf32>,
    return
  }
  func.func @transform_0(%arg0: i32, %arg1: i32) -> (i32, i32) {
    %c0_i32 = arith.constant 0 : i32
    %c0_i32_0 = arith.constant 0 : i32
    return %arg1, %c0_i32 : i32, i32
  }
  func.func @transform_1(%arg0: i32, %arg1: i32) -> (i32, i32) {
    %c0_i32 = arith.constant 0 : i32
    %c0_i32_0 = arith.constant 0 : i32
    return %c0_i32, %arg0 : i32, i32
  }
  func.func @transform_2(%arg0: i32, %arg1: i32) -> (i32, i32) {
    %c0_i32 = arith.constant 0 : i32
    return %arg1, %arg0 : i32, i32
  }
}

</mosaic_0001>

<bundles_post_ra>
// kernel: patch_embed_forward.1
= control target key start
LH: loop header
LB: loop body
LE: loop exit
PB: predicated region body
PF: predicated region fallthrough
CT: control target
= control target key end

     0   :  { %vm24_vm0 = vcmask 523264   ;;  %s302_s0 = inlined_call_operand.vmem [shape: f32[32,64], index: 0, kind: input, shape index: {}]   ;;  %s303_s1 = inlined_call_operand.vmem [shape: f32[64,32], index: 1, kind: input, shape index: {}]   ;;  %s304_s2 = inlined_call_operand.hbm [shape: f32[32,32], index: 2, kind: output, shape index: {}]  }
   0x1   :  { %v16_v0 = vld [vmem:[%s303_s1] sm:$0xff]  ;;  %v17_v1 = vld [vmem:[%s303_s1 + $0x8] sm:$0xff]  ;;  %v18_v2 = vld [vmem:[%s303_s1 + $0x10] sm:$0xff] }
   0x2   :  { %v181_v3 = vpack.c.bf16 %v17_v1, %v16_v0  ;;  %v19_v4 = vld [vmem:[%s303_s1 + $0x18] sm:$0xff]  ;;  %v20_v6 = vld [vmem:[%s303_s1 + $0x20] sm:$0xff]  ;;  %v21_v7 = vld [vmem:[%s303_s1 + $0x28] sm:$0xff] }
   0x3   :  { %v185_v5 = vpack.c.bf16 %v19_v4, %v18_v2  ;;  %v12_v8 = vld [vmem:[%s302_s0] sm:$0xff]  ;;  %v14_v9 = vld [vmem:[%s302_s0 + $0x10] sm:$0xff] }
   0x4   :  { %182 = vmatprep.subr.bf16.mxu0 %v181_v3  ;;  %197 = vmatprep.subr.bf16.mxu1 %v181_v3 }
   0x5   :  { %184 = vmatpush3.bf16.msra.mxu0 %v181_v3  ;;  %201 = vmatpush3.bf16.msra.mxu1 %v181_v3 }
   0x6   :  { %7 = vsyncpa [#allocation3], 0  ;;  %186 = vmatprep.subr.bf16.mxu0 %v185_v5  ;;  %198 = vmatprep.subr.bf16.mxu1 %v185_v5  ;;  %v189_v10 = vpack.c.bf16 %v21_v7, %v20_v6  ;;  %v22_v11 = vld [vmem:[%s303_s1 + $0x30] sm:$0xff]  ;;  %v23_v12 = vld [vmem:[%s303_s1 + $0x38] sm:$0xff]  ;;  %s232_s4 = smov [#allocation2]   ;;  %vm122_vm1 = vcmask 261120  }
   0x7   :  { %175 = vmatprep.mubr.msk.f32.mxu0 %vm24_vm0, %v12_v8  ;;  %178 = vmatprep.mubr.msk.f32.mxu1 %vm24_vm0, %v14_v9  ;;  %v193_v13 = vpack.c.bf16 %v23_v12, %v22_v11  ;;  %v13_v14 = vld [vmem:[%s302_s0 + $0x8] sm:$0xff]  ;;  %v15_v15 = vld [vmem:[%s302_s0 + $0x18] sm:$0xff]  ;;  %s132_s5 = sshll.u32 %s232_s4, 4  ;;  %s133_s5 = int_to_ptr.vmem [resolvable:$true] %s132_s5 }
   0x8   :  { %s208_s6 = scalar_lea.vmem %s133_s5, 512  ;;  %p213_p1 = scmp.lt.s32.totalorder %s133_s5, %s133_s5 }
   0x9   :  { %188 = vmatpush3.bf16.msra.mxu0 %v185_v5  ;;  %202 = vmatpush3.bf16.msra.mxu1 %v185_v5  ;;  %p209_p0 = scmp.ne.s32.totalorder %s133_s5, %s208_s6  ;;  %p214_p2 = scmp.lt.s32.totalorder %s208_s6, %s208_s6 }
   0xa   :  { %190 = vmatprep.subr.bf16.mxu0 %v189_v10  ;;  %199 = vmatprep.subr.bf16.mxu1 %v189_v10 }
   0xb   :  { %p215_p3 = por %p214_p2, %p213_p1 }
   0xd   :  { %192 = vmatpush3.bf16.msra.mxu0 %v189_v10  ;;  %203 = vmatpush3.bf16.msra.mxu1 %v189_v10  ;;  %p216_p4 = pnand %p215_p3, %p209_p0 }
   0xe   :  { %194 = vmatprep.subr.bf16.mxu0 %v193_v13  ;;  %200 = vmatprep.subr.bf16.mxu1 %v193_v13 }
  0x11   :  { %196 = vmatpush3.bf16.msra.mxu0 %v193_v13  ;;  %204 = vmatpush3.bf16.msra.mxu1 %v193_v13 }
  0x14   :  { %176 = vmatmul.mubr.msk.f32.vlgmr.msra.gmra.mrb[0].mxu0 %vm24_vm0, %v13_v14  ;;  %179 = vmatmul.mubr.msk.f32.vlgmr.msra.gmra.mrb[0].mxu1 %vm24_vm0, %v15_v15 }
  0xe7   :  { %v177_v16 = vpop.f32.mrb[0].mxu0  ;;  %v180_v17 = vpop.f32.mrb[0].mxu1 }
  0xe8   :  { %124 = vst.msk [vmem:[#allocation2 + $0x8] sm:$0xff] %vm122_vm1, %v177_v16  ;;  %126 = vst.msk [vmem:[#allocation2 + $0x18] sm:$0xff] %vm122_vm1, %v180_v17  ;;  %v103_v18 = vpop.f32.mrb[1].mxu0  ;;  %v113_v19 = vpop.f32.mrb[1].mxu1 }
  0xe9   :  { %123 = vst.msk [vmem:[#allocation2] sm:$0xff] %vm122_vm1, %v103_v18  ;;  %125 = vst.msk [vmem:[#allocation2 + $0x10] sm:$0xff] %vm122_vm1, %v113_v19 }
  0xea   :  { %219 = shalt.err (!%p216_p4)
}
  0xeb   :  { %s220_s8 = scalar_lea.hbm %s304_s2, 512 }
  0xec   :  { %p221_p5 = scmp.ne.s32.totalorder %s304_s2, %s220_s8  ;;  %p224_p6 = scmp.lt.u32.totalorder %s220_s8, %s304_s2 }
  0xee   :  { %p226_p7 = pnand %p224_p6, %p221_p5 }
  0xf0   :  { %229 = shalt.err (!%p226_p7)
}
  0xf1   :  { %s233_s13 = smov 128   ;;  %s234_s14 = smov 8  }
  0xf2   :  { %138 = dma.vmem_to_hbm [thread:$0]  %s133_s5, 512, %s304_s2, [#allocation3], %s233_s13, %s233_s13, %s234_s14  }
  0xf3   :  { %230 = dma.done.wait [#allocation3], 512  }
  0xf4   :  { %231 = vsyncadd [#allocation3], 4294966784 }
  0xf5   :  { %142 = vsyncpa [#allocation3], 1 }

</bundles_post_ra>
